<compile_context>
chip_gen: v5e
topology: v5e:2x2
jax: 0.10.0
libtpu: 0.0.40
codegen_flags: <defaults>
</compile_context>

<pallas_src>
import functools

import jax
import jax.numpy as jnp
from jax import lax
from jax.experimental import pallas as pl
from jax.experimental.pallas import tpu as pltpu

LANES = 128
SUBLANES = 8
# ~1 MiB of VMEM per input per pipeline buffer (proven-safe size; 2 inputs x
# 2 buffers = 4 MiB of DMA buffers plus elementwise temporaries).
_TARGET_TILE_BYTES = 1 << 20


def _round_up(x: int, m: int) -> int:
    return ((x + m - 1) // m) * m


def _choose_tile_rows(num_rows: int, num_cols: int, itemsize: int) -> int:
    """Pick a row-block size: multiple of 8 (or the full row count)."""
    cols_padded = _round_up(num_cols, LANES)  # VMEM lane padding
    tile = _TARGET_TILE_BYTES // (cols_padded * itemsize)
    tile = max(SUBLANES, (tile // SUBLANES) * SUBLANES)
    if num_rows <= tile:
        return num_rows  # single block covering all rows (always legal)
    return tile


def _log_stft_mag_loss_kernel(x_ref, y_ref, out_ref, *, total_rows, tile_rows, ragged):
    # x_ref / y_ref: (tile_rows, freq_bins) VMEM tiles in the input dtype.
    x = x_ref[...].astype(jnp.float32)
    y = y_ref[...].astype(jnp.float32)

    if ragged:
        # Rows past the end of the array in the last (partial) grid block hold
        # unspecified data.  Substitute 1.0 into both inputs there:
        # |log(1) - log(1)| == 0, so the padding never biases the sum.
        row = lax.broadcasted_iota(jnp.int32, (tile_rows, 1), 0)
        valid = (pl.program_id(0) * tile_rows + row) < total_rows
        x = jnp.where(valid, x, 1.0)
        y = jnp.where(valid, y, 1.0)

    # logs on EUP, sub/abs on VPU, fold + cross-lane reduce on VPU/XLU -- all
    # have slack; the kernel is HBM-bandwidth-bound.
    s = jnp.sum(jnp.abs(jnp.log(y) - jnp.log(x)))

    # Emit the per-tile scalar partial sum as a one-hot (8, 128) vreg so the
    # output block stays (sublane, lane)-aligned; all other entries are 0.
    r = lax.broadcasted_iota(jnp.int32, (SUBLANES, LANES), 0)
    c = lax.broadcasted_iota(jnp.int32, (SUBLANES, LANES), 1)
    out_ref[0] = jnp.where((r == 0) & (c == 0), s, 0.0)


def log_stft_magnitude_loss(x_mag: jax.Array, y_mag: jax.Array, *, tile_rows=None) -> jax.Array:
    """Pallas implementation of F.l1_loss(log(y_mag), log(x_mag))."""
    assert x_mag.shape == y_mag.shape, (x_mag.shape, y_mag.shape)
    assert x_mag.dtype == y_mag.dtype, (x_mag.dtype, y_mag.dtype)
    n = x_mag.size
    assert n > 0

    q = x_mag.shape[-1]           # freq_bins -> lane axis (full width per block)
    rows = n // q                 # B * #frames collapsed -> row axis
    # Free reshapes (no data movement): collapse leading dims only.
    x2 = x_mag.reshape(rows, q)
    y2 = y_mag.reshape(rows, q)

    itemsize = jnp.dtype(x_mag.dtype).itemsize
    if tile_rows is None:
        tile_rows = _choose_tile_rows(rows, q, itemsize)
    assert tile_rows == rows or tile_rows % SUBLANES == 0, tile_rows

    grid_rows = pl.cdiv(rows, tile_rows)
    ragged = (rows % tile_rows) != 0

    kernel = functools.partial(
        _log_stft_mag_loss_kernel,
        total_rows=rows,
        tile_rows=tile_rows,
        ragged=ragged,
    )

    partials = pl.pallas_call(
        kernel,
        out_shape=jax.ShapeDtypeStruct((grid_rows, SUBLANES, LANES), jnp.float32),
        grid_spec=pltpu.PrefetchScalarGridSpec(
            num_scalar_prefetch=0,
            grid=(grid_rows,),
            in_specs=[
                pl.BlockSpec((tile_rows, q), lambda i: (i, 0)),
                pl.BlockSpec((tile_rows, q), lambda i: (i, 0)),
            ],
            out_specs=pl.BlockSpec((1, SUBLANES, LANES), lambda i: (i, 0, 0)),
        ),
        compiler_params=pltpu.CompilerParams(
            # Tiles are fully independent -> shard across TCs on v7x.
            dimension_semantics=("parallel",),
            vmem_limit_bytes=32 * 1024 * 1024,
        ),
    )(x2, y2)

    # Single tiny cross-tile reduce + mean over the *true* element count, in JAX.
    return jnp.sum(partials) / jnp.float32(n)


if __name__ == "__main__":
    key = jax.random.PRNGKey(0)
    keys = jax.random.split(key, 8)

    def _check(x, y, loss, rtol=1e-5, atol=1e-6):
        ref = jnp.mean(jnp.abs(jnp.log(y.astype(jnp.float32)) - jnp.log(x.astype(jnp.float32))))
        assert jnp.allclose(loss, ref, rtol=rtol, atol=atol), (loss, ref)

    # Case 1: lane-aligned freq bins.
    x1 = jax.random.uniform(keys[0], (2, 8, 128), jnp.float32, minval=0.1, maxval=4.0)
    y1 = jax.random.uniform(keys[1], (2, 8, 128), jnp.float32, minval=0.1, maxval=4.0)
    l1 = log_stft_magnitude_loss(x1, y1)
    jax.block_until_ready(l1)
    _check(x1, y1, l1)

    # Case 2: non-multiple-of-128 freq bins (typical STFT, e.g. n_fft//2 + 1).
    x2 = jax.random.uniform(keys[2], (2, 6, 65), jnp.float32, minval=0.1, maxval=4.0)
    y2 = jax.random.uniform(keys[3], (2, 6, 65), jnp.float32, minval=0.1, maxval=4.0)
    l2 = log_stft_magnitude_loss(x2, y2)
    jax.block_until_ready(l2)
    _check(x2, y2, l2)

    # Case 3: multi-tile grid with a ragged last row-block (exercises the
    # in-kernel row masking path) by forcing a small tile_rows.
    x3 = jax.random.uniform(keys[4], (3, 15, 33), jnp.float32, minval=0.1, maxval=4.0)
    y3 = jax.random.uniform(keys[5], (3, 15, 33), jnp.float32, minval=0.1, maxval=4.0)
    l3 = log_stft_magnitude_loss(x3, y3, tile_rows=16)   # rows=45 -> 3 blocks, last partial
    jax.block_until_ready(l3)
    _check(x3, y3, l3)

    # Case 4: bf16 inputs (halved HBM bytes; cast to f32 happens in-kernel).
    x4 = jax.random.uniform(keys[6], (2, 7, 65), jnp.float32, minval=0.1, maxval=4.0).astype(jnp.bfloat16)
    y4 = jax.random.uniform(keys[7], (2, 7, 65), jnp.float32, minval=0.1, maxval=4.0).astype(jnp.bfloat16)
    l4 = log_stft_magnitude_loss(x4, y4)
    jax.block_until_ready(l4)
    _check(x4, y4, l4, rtol=1e-4, atol=1e-5)

    print("KERNEL_OK")
</pallas_src>

<mosaic_0001>
module attributes {stable_mosaic.version = 11 : i64} {
  func.func @_log_stft_mag_loss_kernel(%arg0: i32, %arg1: memref<16x128xf32, #tpu.memory_space<vmem>>, %arg2: memref<16x128xf32, #tpu.memory_space<vmem>>, %arg3: memref<1x8x128xf32, #tpu.memory_space<vmem>>) attributes {dimension_semantics = [#tpu.dimension_semantics<parallel>], iteration_bounds = array<i64: 1>, scalar_prefetch = 0 : i64, scratch_operands = 0 : i64, tpu.core_type = #tpu.core_type<tc>, window_params = [{transform_indices = @transform_0, window_bounds = array<i64: 16, 128>}, {transform_indices = @transform_1, window_bounds = array<i64: 16, 128>}, {transform_indices = @transform_2, window_bounds = array<i64: 1, 8, 128>}]} {
    %c0 = arith.constant 0 : index
    %c0_0 = arith.constant 0 : index
    %0 = vector.load %arg1[%c0, %c0_0] : memref<16x128xf32, #tpu.memory_space<vmem>>, vector<16x128xf32>
    %c0_1 = arith.constant 0 : index
    %c0_2 = arith.constant 0 : index
    %1 = vector.load %arg2[%c0_1, %c0_2] : memref<16x128xf32, #tpu.memory_space<vmem>>, vector<16x128xf32>
    %2 = math.log %1 : vector<16x128xf32>
    %3 = math.log %0 : vector<16x128xf32>
    %4 = arith.subf %2, %3 : vector<16x128xf32>
    %5 = math.absf %4 : vector<16x128xf32>
    %6 = vector.shape_cast %5 : vector<16x128xf32> to vector<1x16x128xf32>
    %cst = arith.constant dense<0.000000e+00> : vector<1xf32>
    %7 = vector.multi_reduction <add>, %6, %cst [1, 2] : vector<1x16x128xf32> to vector<1xf32>
    %8 = vector.shape_cast %7 : vector<1xf32> to vector<1x1x1xf32>
    %9 = vector.extract %8[0, 0, 0] : f32 from vector<1x1x1xf32>
    %10 = tpu.iota {dimensions = array<i32: 0>} : vector<8x128xi32>
    %11 = tpu.iota {dimensions = array<i32: 1>} : vector<8x128xi32>
    %c0_i32 = arith.constant 0 : i32
    %12 = vector.broadcast %c0_i32 : i32 to vector<8x128xi32>
    %13 = arith.cmpi eq, %10, %12 : vector<8x128xi32>
    %c0_i32_3 = arith.constant 0 : i32
    %14 = vector.broadcast %c0_i32_3 : i32 to vector<8x128xi32>
    %15 = arith.cmpi eq, %11, %14 : vector<8x128xi32>
    %16 = arith.andi %13, %15 : vector<8x128xi1>
    %cst_4 = arith.constant 0.000000e+00 : f32
    %17 = vector.broadcast %9 : f32 to vector<8x128xf32>
    %18 = vector.broadcast %cst_4 : f32 to vector<8x128xf32>
    %19 = arith.select %16, %17, %18 : vector<8x128xi1>, vector<8x128xf32>
    %c0_5 = arith.constant 0 : index
    %c0_6 = arith.constant 0 : index
    %c0_7 = arith.constant 0 : index
    %20 = vector.load %arg3[%c0_5, %c0_6, %c0_7] : memref<1x8x128xf32, #tpu.memory_space<vmem>>, vector<1x8x128xf32>
    %21 = vector.shape_cast %20 : vector<1x8x128xf32> to vector<8x128xf32>
    %22 = vector.shape_cast %19 : vector<8x128xf32> to vector<1x8x128xf32>
    tpu.vector_store %arg3[%c0_5, %c0_6, %c0_7], %22 {strides = array<i32>} : memref<1x8x128xf32, #tpu.memory_space<vmem>>, vector<1x8x128xf32>,
    return
  }
  func.func @transform_0(%arg0: i32) -> (i32, i32) {
    %c0_i32 = arith.constant 0 : i32
    %c0_i32_0 = arith.constant 0 : i32
    return %arg0, %c0_i32 : i32, i32
  }
  func.func @transform_1(%arg0: i32) -> (i32, i32) {
    %c0_i32 = arith.constant 0 : i32
    %c0_i32_0 = arith.constant 0 : i32
    return %arg0, %c0_i32 : i32, i32
  }
  func.func @transform_2(%arg0: i32) -> (i32, i32, i32) {
    %c0_i32 = arith.constant 0 : i32
    %c0_i32_0 = arith.constant 0 : i32
    %c0_i32_1 = arith.constant 0 : i32
    return %arg0, %c0_i32, %c0_i32_0 : i32, i32, i32
  }
}

</mosaic_0001>

<bundles_post_ra>
// kernel: tpu_custom_call.1
= control target key start
LH: loop header
LB: loop body
LE: loop exit
PB: predicated region body
PF: predicated region fallthrough
CT: control target
= control target key end

     0   :  { %7 = vsyncpa [#allocation3], 0  ;;  %s220_s0 = inlined_call_operand.hbm [shape: f32[16,128], index: 0, kind: input, shape index: {}]   ;;  %s221_s1 = inlined_call_operand.hbm [shape: f32[16,128], index: 1, kind: input, shape index: {}]   ;;  %s222_s2 = inlined_call_operand.hbm [shape: f32[1,8,128], index: 2, kind: output, shape index: {}]  }
   0x1   :  { %8 = vsyncpa [#allocation6], 0 }
   0x2   :  { %9 = vsyncpa [#allocation4], 0  ;;  %s14_s11 = sshll.u32 %s220_s0, 4  ;;  %s191_s12 = smov [#allocation2]   ;;  %s15_s11 = int_to_ptr.hbm [resolvable:$true] %s14_s11 }
   0x3   :  { %s16_s13 = sshll.u32 %s191_s12, 4  ;;  %s27_s16 = sshll.u32 %s221_s1, 4  ;;  %s17_s13 = int_to_ptr.vmem [resolvable:$true] %s16_s13  ;;  %s28_s16 = int_to_ptr.hbm [resolvable:$true] %s27_s16 }
   0x4   :  { %s192_s17 = smov 128   ;;  %s193_s18 = smov 8  }
   0x5   :  { %22 = dma.hbm_to_vmem [thread:$0]  %s15_s11, 256, %s17_s13, [#allocation3], %s192_s17, %s192_s17, %s193_s18  }
   0x6   :  { %s194_s19 = smov [#allocation5]  }
   0x7   :  { %s29_s20 = sshll.u32 %s194_s19, 4  ;;  %s30_s20 = int_to_ptr.vmem [resolvable:$true] %s29_s20 }
   0x8   :  { %35 = dma.hbm_to_vmem [thread:$0]  %s28_s16, 256, %s30_s20, [#allocation6], %s192_s17, %s192_s17, %s193_s18  }
   0x9   :  { %185 = dma.done.wait [#allocation3], 256  }
   0xa   :  { %186 = vsyncadd [#allocation3], 4294967040 }
   0xb   :  { %187 = dma.done.wait [#allocation6], 256  }
   0xc   :  { %188 = vsyncadd [#allocation6], 4294967040  ;;  %v44_v0 = vld [vmem:[#allocation2] sm:$0xff]  ;;  %v46_v1 = vld [vmem:[#allocation5] sm:$0xff]  ;;  %v70_v24 = vlaneseq  ;;  %s195_s0 = smov [#allocation7]   ;;  %s87_s23 = sshll.u32 %s222_s2, 4  ;;  %s88_s23 = int_to_ptr.hbm [resolvable:$true] %s87_s23 }
   0xd   :  { %v45_v2 = vld [vmem:[#allocation2 + $0x8] sm:$0xff]  ;;  %v47_v3 = vld [vmem:[#allocation5 + $0x8] sm:$0xff]  ;;  %105 = vlog2.f32 %v46_v1  ;;  %s85_s1 = sshll.u32 %s195_s0, 4  ;;  %s86_s1 = int_to_ptr.vmem [resolvable:$true] %s85_s1 }
   0xe   :  { %107 = vlog2.f32 %v47_v3  ;;  %v71_v25 = vshrl.u32 %v70_v24, 7  ;;  %v73_v26 = vand.u32 127, %v70_v24 }
   0xf   :  { %109 = vlog2.f32 %v44_v0 }
  0x10   :  { %111 = vlog2.f32 %v45_v2  ;;  %vm74_vm0 = vcmp.eq.s32.totalorder %v71_v25, 0  ;;  %vm75_vm1 = vcmp.eq.s32.totalorder %v73_v26, 0 }
  0x11   :  { %vm76_vm2 = vmand %vm74_vm0, %vm75_vm1 }
  0x13   :  { %v106_v4 = vpop.eup %105 }
  0x14   :  { %v108_v5 = vpop.eup %107  ;;  %v49_v6 = vmul.f32 0.6931472, %v106_v4 }
  0x15   :  { %v110_v7 = vpop.eup %109  ;;  %v51_v8 = vmul.f32 0.6931472, %v108_v5 }
  0x16   :  { %v112_v9 = vpop.eup %111  ;;  %v53_v10 = vmul.f32 0.6931472, %v110_v7 }
  0x17   :  { %v55_v11 = vmul.f32 0.6931472, %v112_v9 }
  0x18   :  { %v56_v12 = vsub.f32 %v49_v6, %v53_v10 }
  0x19   :  { %v57_v13 = vsub.f32 %v51_v8, %v55_v11 }
  0x1a   :  { %v58_v14 = vand.u32 2147483647, %v56_v12 }
  0x1b   :  { %v59_v15 = vand.u32 2147483647, %v57_v13 }
  0x1d   :  { %v60_v16 = vadd.f32 %v59_v15, %v58_v14 }
  0x1f   :  { %61 = vadd.xlane.f32.xlu0 %v60_v16 }
  0x92   :  { %v62_v17 = vpop.xlane.xlu0 %61 }
  0x93   :  { %v63_v18 = vrot.slane %v62_v17, 4 }
  0x95   :  { %v64_v19 = vadd.f32 %v63_v18, %v62_v17 }
  0x97   :  { %v65_v20 = vrot.slane %v64_v19, 2 }
  0x99   :  { %v66_v21 = vadd.f32 %v65_v20, %v64_v19 }
  0x9b   :  { %v67_v22 = vrot.slane %v66_v21, 1 }
  0x9d   :  { %v68_v23 = vadd.f32 %v67_v22, %v66_v21 }
  0x9f   :  { %98 = vpush %v68_v23 }
  0xd0   :  { %s99_s24 = spop %98 }
  0xd1   :  { %v77_v27 = vstv %s99_s24 }
  0xd2   :  { %v78_v28 = vsel %vm76_vm2, %v77_v27, 0.0 }
  0xd3   :  { %79 = vst [vmem:[#allocation7] sm:$0xff] %v78_v28 }
  0xd4   :  { %90 = dma.vmem_to_hbm [thread:$0]  %s86_s1, 128, %s88_s23, [#allocation4]  }
  0xd5   :  { %189 = dma.done.wait [#allocation4], 128  }
  0xd6   :  { %190 = vsyncadd [#allocation4], 4294967168 }
  0xd7   :  { %95 = vsyncpa [#allocation3], 1 }
  0xd8   :  { %96 = vsyncpa [#allocation6], 1 }
  0xd9   :  { %97 = vsyncpa [#allocation4], 1 }

</bundles_post_ra>
